<compile_context>
chip_gen: v7x
topology: tpu7x:2x2x1
jax: 0.10.0
libtpu: 0.0.40
codegen_flags: <defaults>
</compile_context>

<pallas_src>
import functools

import jax
import jax.numpy as jnp
from jax import lax
from jax.experimental import pallas as pl
from jax.experimental.pallas import tpu as pltpu

EPS = 1e-5                     # nn.BatchNorm2d default eps
LANE = 128                     # pad K / OC to multiples of the lane width
MAX_TM = 512                   # rows per M tile (multiple of 8), v7x-safe
VMEM_LIMIT = 32 * 1024 * 1024  # explicit scoped-VMEM budget (works v5e/v6e/v7x)


def _round_up(x, m):
    return (x + m - 1) // m * m


# ----------------------------- Pallas kernels --------------------------------

def _stats_kernel(p_ref, w_ref, sum_ref, sq_ref):
    """Accumulate per-output-channel sum and sum-of-squares of y = P @ W."""
    @pl.when(pl.program_id(0) == 0)
    def _init():
        sum_ref[...] = jnp.zeros_like(sum_ref)
        sq_ref[...] = jnp.zeros_like(sq_ref)

    y = jnp.dot(p_ref[...], w_ref[...], preferred_element_type=jnp.float32)
    sum_ref[...] += jnp.sum(y, axis=0, keepdims=True)
    sq_ref[...] += jnp.sum(y * y, axis=0, keepdims=True)


def _affine_relu_kernel(p_ref, w_ref, a_ref, c_ref, o_ref):
    """o = relu((P @ W) * a + c) -- BN folded into per-channel (a, c)."""
    y = jnp.dot(p_ref[...], w_ref[...], preferred_element_type=jnp.float32)
    o_ref[...] = jnp.maximum(y * a_ref[...] + c_ref[...], 0.0)


def _bias_kernel(p_ref, w_ref, b_ref, o_ref):
    """o = P @ W + b   (final conv14: no BN, no ReLU)."""
    o_ref[...] = (jnp.dot(p_ref[...], w_ref[...],
                          preferred_element_type=jnp.float32) + b_ref[...])


# --------------------------- pallas_call drivers ------------------------------

@functools.partial(jax.jit, static_argnames=("tm",))
def _run_stats(p, w, *, tm):
    mp, kp = p.shape
    ocp = w.shape[1]
    return pl.pallas_call(
        _stats_kernel,
        out_shape=(jax.ShapeDtypeStruct((1, ocp), jnp.float32),
                   jax.ShapeDtypeStruct((1, ocp), jnp.float32)),
        grid=(mp // tm,),
        in_specs=[pl.BlockSpec((tm, kp), lambda i: (i, 0)),
                  pl.BlockSpec((kp, ocp), lambda i: (0, 0))],
        out_specs=(pl.BlockSpec((1, ocp), lambda i: (0, 0)),
                   pl.BlockSpec((1, ocp), lambda i: (0, 0))),
        compiler_params=pltpu.CompilerParams(
            dimension_semantics=("arbitrary",),        # resident accumulators
            vmem_limit_bytes=VMEM_LIMIT),
    )(p, w)


@functools.partial(jax.jit, static_argnames=("tm",))
def _run_affine_relu(p, w, a, c, *, tm):
    mp, kp = p.shape
    ocp = w.shape[1]
    return pl.pallas_call(
        _affine_relu_kernel,
        out_shape=jax.ShapeDtypeStruct((mp, ocp), jnp.float32),
        grid=(mp // tm,),
        in_specs=[pl.BlockSpec((tm, kp), lambda i: (i, 0)),
                  pl.BlockSpec((kp, ocp), lambda i: (0, 0)),
                  pl.BlockSpec((1, ocp), lambda i: (0, 0)),
                  pl.BlockSpec((1, ocp), lambda i: (0, 0))],
        out_specs=pl.BlockSpec((tm, ocp), lambda i: (i, 0)),
        compiler_params=pltpu.CompilerParams(
            dimension_semantics=("parallel",),         # megacore row-tile split
            vmem_limit_bytes=VMEM_LIMIT),
    )(p, w, a, c)


@functools.partial(jax.jit, static_argnames=("tm",))
def _run_bias(p, w, b, *, tm):
    mp, kp = p.shape
    ocp = w.shape[1]
    return pl.pallas_call(
        _bias_kernel,
        out_shape=jax.ShapeDtypeStruct((mp, ocp), jnp.float32),
        grid=(mp // tm,),
        in_specs=[pl.BlockSpec((tm, kp), lambda i: (i, 0)),
                  pl.BlockSpec((kp, ocp), lambda i: (0, 0)),
                  pl.BlockSpec((1, ocp), lambda i: (0, 0))],
        out_specs=pl.BlockSpec((tm, ocp), lambda i: (i, 0)),
        compiler_params=pltpu.CompilerParams(
            dimension_semantics=("parallel",),
            vmem_limit_bytes=VMEM_LIMIT),
    )(p, w, b)


# ------------------------------ layer wrappers --------------------------------

def _im2col_nhwc(x, kh, kw, sh, sw, ph, pw):
    """NHWC im2col; column index = (kh*KW + kw)*C + c (matches OIHW->HWIO W)."""
    n, h, w, c = x.shape
    if ph or pw:
        x = jnp.pad(x, ((0, 0), (ph, ph), (pw, pw), (0, 0)))
        h += 2 * ph
        w += 2 * pw
    oh = (h - kh) // sh + 1
    ow = (w - kw) // sw + 1
    cols = []
    for i in range(kh):
        for j in range(kw):
            cols.append(x[:, i:i + sh * oh:sh, j:j + sw * ow:sw, :])
    patches = jnp.stack(cols, axis=3)                 # [N, OH, OW, KH*KW, C]
    return patches.reshape(n * oh * ow, kh * kw * c), (n, oh, ow)


def _pad_matmul_operands(patches, w2):
    m, k = patches.shape
    oc = w2.shape[1]
    kp = _round_up(k, LANE)
    ocp = _round_up(oc, LANE)
    tm = min(MAX_TM, _round_up(m, 8))
    mp = _round_up(m, tm)
    p = jnp.pad(patches.astype(jnp.float32), ((0, mp - m), (0, kp - k)))
    w = jnp.pad(w2.astype(jnp.float32), ((0, kp - k), (0, ocp - oc)))
    return p, w, tm


def conv_bn_relu(x, weight, gamma, beta, stride=(1, 1), padding=(0, 0)):
    """x: [N,H,W,C]; weight: [OC,IC,KH,KW] (PyTorch layout); returns NHWC.

    Conv2d bias is dropped: it is exactly cancelled by train-mode BatchNorm.
    """
    oc, ic, kh, kw = weight.shape
    patches, (n, oh, ow) = _im2col_nhwc(x, kh, kw, stride[0], stride[1],
                                        padding[0], padding[1])
    m = patches.shape[0]
    w2 = weight.transpose(2, 3, 1, 0).reshape(kh * kw * ic, oc)
    p, w, tm = _pad_matmul_operands(patches, w2)
    ocp = w.shape[1]

    # Pass 1: per-channel batch statistics (zero-padded rows contribute 0).
    s, q = _run_stats(p, w, tm=tm)
    mean = s / m
    var = jnp.maximum(q / m - mean * mean, 0.0)       # biased train-mode var
    inv_std = lax.rsqrt(var + EPS)

    # Fold BN + gamma/beta into one per-channel scale and shift.
    gamma_p = jnp.pad(gamma.astype(jnp.float32).reshape(1, oc),
                      ((0, 0), (0, ocp - oc)), constant_values=1.0)
    beta_p = jnp.pad(beta.astype(jnp.float32).reshape(1, oc),
                     ((0, 0), (0, ocp - oc)))
    a = gamma_p * inv_std
    c = beta_p - mean * a

    # Pass 2: streaming conv + folded affine + ReLU over parallel M tiles.
    out = _run_affine_relu(p, w, a, c, tm=tm)
    return out[:m, :oc].reshape(n, oh, ow, oc)


def deconv_bn_relu(x, weight_t, gamma, beta, stride=(1, 2), padding=(0, 1)):
    """ConvTranspose2d (PyTorch [IC,OC,KH,KW] weight) + BN + ReLU, NHWC."""
    ic, oc, kh, kw = weight_t.shape
    sh, sw = stride
    ph, pw = padding
    n, h, w, c = x.shape
    # zero-insert (stride) + pad by (k-1-p): transposed conv == stride-1 conv
    # with the spatially flipped, IO-swapped kernel.
    xz = jnp.zeros((n, (h - 1) * sh + 1, (w - 1) * sw + 1, c), x.dtype)
    xz = xz.at[:, ::sh, ::sw, :].set(x)
    xz = jnp.pad(xz, ((0, 0), (kh - 1 - ph,) * 2, (kw - 1 - pw,) * 2, (0, 0)))
    w_conv = jnp.flip(weight_t, axis=(2, 3)).transpose(1, 0, 2, 3)  # [OC,IC,KH,KW]
    return conv_bn_relu(xz, w_conv, gamma, beta)


def conv_bias(x, weight, bias, stride=(1, 1), padding=(0, 0)):
    """Plain Conv2d + bias (conv14)."""
    oc, ic, kh, kw = weight.shape
    patches, (n, oh, ow) = _im2col_nhwc(x, kh, kw, stride[0], stride[1],
                                        padding[0], padding[1])
    m = patches.shape[0]
    w2 = weight.transpose(2, 3, 1, 0).reshape(kh * kw * ic, oc)
    p, w, tm = _pad_matmul_operands(patches, w2)
    ocp = w.shape[1]
    b = jnp.pad(bias.astype(jnp.float32).reshape(1, oc), ((0, 0), (0, ocp - oc)))
    out = _run_bias(p, w, b, tm=tm)
    return out[:m, :oc].reshape(n, oh, ow, oc)


# TODO(synk): MaxPool2d(ceil_mode), stride-2 zero insertion, channel concat and
# residual adds remain plain XLA glue ops (layout/memory work, not MXU work).
def maxpool_ceil(x, kernel=(3, 3), stride=(1, 2), padding=(1, 0)):
    n, h, w, c = x.shape
    kh, kw = kernel
    sh, sw = stride
    ph, pw = padding
    oh = -(-(h + 2 * ph - kh) // sh) + 1
    ow = -(-(w + 2 * pw - kw) // sw) + 1
    if (oh - 1) * sh >= h + ph:
        oh -= 1
    if (ow - 1) * sw >= w + pw:
        ow -= 1
    pad_h_hi = max((oh - 1) * sh + kh - h - ph, 0)
    pad_w_hi = max((ow - 1) * sw + kw - w - pw, 0)
    xp = jnp.pad(x, ((0, 0), (ph, pad_h_hi), (pw, pad_w_hi), (0, 0)),
                 constant_values=-jnp.inf)
    return lax.reduce_window(xp, -jnp.inf, lax.max,
                             (1, kh, kw, 1), (1, sh, sw, 1), "VALID")


# ------------------------------ network blocks --------------------------------

def _conv_layer(p, x, stride=(1, 1), padding=(0, 0)):
    return conv_bn_relu(x, p["w"], p["gamma"], p["beta"], stride, padding)


def _fire(p, x):
    s = _conv_layer(p["sq"], x)
    return jnp.concatenate(
        [_conv_layer(p["e1"], s), _conv_layer(p["e3"], s, padding=(1, 1))],
        axis=-1)


def _fire_deconv(p, x):
    s = _conv_layer(p["sq"], x)
    s = deconv_bn_relu(s, p["de"]["w"], p["de"]["gamma"], p["de"]["beta"])
    return jnp.concatenate(
        [_conv_layer(p["e1"], s), _conv_layer(p["e3"], s, padding=(1, 1))],
        axis=-1)


def squeezeseg_generator(params, x):
    """x: [N, H, W, channels]; output: [N, H, W, 1].  The module permutes to
    NCHW and back; we stay NHWC end-to-end, matching its in/out layout."""
    out_c1 = _conv_layer(params["conv1"], x, stride=(1, 2), padding=(1, 1))
    skip = _conv_layer(params["conv1_skip"], x)
    out = maxpool_ceil(out_c1)
    out_f3 = _fire(params["fire3"], _fire(params["fire2"], out))
    out = maxpool_ceil(out_f3)
    out_f5 = _fire(params["fire5"], _fire(params["fire4"], out))
    out = maxpool_ceil(out_f5)
    out = _fire(params["fire9"],
                _fire(params["fire8"],
                      _fire(params["fire7"],
                            _fire(params["fire6"], out))))
    out = _fire_deconv(params["fire10"], out) + out_f5
    out = _fire_deconv(params["fire11"], out) + out_f3
    out = _fire_deconv(params["fire12"], out) + out_c1
    out = _fire_deconv(params["fire13"], out) + skip
    # TODO(synk): nn.Dropout2d is stochastic in train mode; applied as identity
    # (inference semantics) to keep the kernel deterministic.
    return conv_bias(out, params["conv14"]["w"], params["conv14"]["b"],
                     padding=(1, 1))


# --------------------------------- params -------------------------------------

def _conv_params(key, ic, oc, k):
    kw_, kg, kb = jax.random.split(key, 3)
    scale = 1.0 / (ic * k * k) ** 0.5
    return {"w": scale * jax.random.normal(kw_, (oc, ic, k, k), jnp.float32),
            "gamma": 1.0 + 0.1 * jax.random.normal(kg, (oc,), jnp.float32),
            "beta": 0.1 * jax.random.normal(kb, (oc,), jnp.float32)}


def _deconv_params(key, ic, oc, kh, kw):
    kw_, kg, kb = jax.random.split(key, 3)
    scale = 1.0 / (ic * kh * kw) ** 0.5
    return {"w": scale * jax.random.normal(kw_, (ic, oc, kh, kw), jnp.float32),
            "gamma": 1.0 + 0.1 * jax.random.normal(kg, (oc,), jnp.float32),
            "beta": 0.1 * jax.random.normal(kb, (oc,), jnp.float32)}


def _fire_params(key, ic, sq, e1, e3):
    k1, k2, k3 = jax.random.split(key, 3)
    return {"sq": _conv_params(k1, ic, sq, 1),
            "e1": _conv_params(k2, sq, e1, 1),
            "e3": _conv_params(k3, sq, e3, 3)}


def _fire_deconv_params(key, ic, sq, e1, e3):
    k1, k2, k3, k4 = jax.random.split(key, 4)
    return {"sq": _conv_params(k1, ic, sq, 1),
            "de": _deconv_params(k2, sq, sq, 1, 4),
            "e1": _conv_params(k3, sq, e1, 1),
            "e3": _conv_params(k4, sq, e3, 3)}


def init_params(key, channels):
    ks = jax.random.split(key, 16)
    kw_, kb = jax.random.split(ks[15])
    return {
        "conv1": _conv_params(ks[0], channels, 64, 3),
        "conv1_skip": _conv_params(ks[1], channels, 64, 1),
        "fire2": _fire_params(ks[2], 64, 16, 64, 64),
        "fire3": _fire_params(ks[3], 128, 16, 64, 64),
        "fire4": _fire_params(ks[4], 128, 32, 128, 128),
        "fire5": _fire_params(ks[5], 256, 32, 128, 128),
        "fire6": _fire_params(ks[6], 256, 48, 192, 192),
        "fire7": _fire_params(ks[7], 384, 48, 192, 192),
        "fire8": _fire_params(ks[8], 384, 64, 256, 256),
        "fire9": _fire_params(ks[9], 512, 64, 256, 256),
        "fire10": _fire_deconv_params(ks[10], 512, 64, 128, 128),
        "fire11": _fire_deconv_params(ks[11], 256, 32, 64, 64),
        "fire12": _fire_deconv_params(ks[12], 128, 16, 32, 32),
        "fire13": _fire_deconv_params(ks[13], 64, 16, 32, 32),
        "conv14": {
            "w": (1.0 / (64 * 9) ** 0.5)
                 * jax.random.normal(kw_, (1, 64, 3, 3), jnp.float32),
            "b": 0.1 * jax.random.normal(kb, (1,), jnp.float32),
        },
    }


# ------------------------------ pure-JAX reference ----------------------------

def _ref_bn_relu(y, gamma, beta):
    mean = y.mean(axis=(0, 1, 2), keepdims=True)
    var = jnp.square(y - mean).mean(axis=(0, 1, 2), keepdims=True)
    yh = (y - mean) * lax.rsqrt(var + EPS)
    return jnp.maximum(yh * gamma.reshape(1, 1, 1, -1)
                       + beta.reshape(1, 1, 1, -1), 0.0)


def _ref_conv_layer(p, x, stride=(1, 1), padding=(0, 0)):
    y = lax.conv_general_dilated(
        x, p["w"], stride, ((padding[0],) * 2, (padding[1],) * 2),
        dimension_numbers=("NHWC", "OIHW", "NHWC"),
        precision=lax.Precision.HIGHEST)
    return _ref_bn_relu(y, p["gamma"], p["beta"])


def _ref_deconv_layer(p, x, stride=(1, 2), padding=(0, 1)):
    ic, oc, kh, kw = p["w"].shape
    wc = jnp.flip(p["w"], axis=(2, 3)).transpose(1, 0, 2, 3)
    y = lax.conv_general_dilated(
        x, wc, (1, 1), ((kh - 1 - padding[0],) * 2, (kw - 1 - padding[1],) * 2),
        lhs_dilation=stride,
        dimension_numbers=("NHWC", "OIHW", "NHWC"),
        precision=lax.Precision.HIGHEST)
    return _ref_bn_relu(y, p["gamma"], p["beta"])


def _ref_fire(p, x):
    s = _ref_conv_layer(p["sq"], x)
    return jnp.concatenate(
        [_ref_conv_layer(p["e1"], s),
         _ref_conv_layer(p["e3"], s, padding=(1, 1))], axis=-1)


def _ref_fire_deconv(p, x):
    s = _ref_conv_layer(p["sq"], x)
    s = _ref_deconv_layer(p["de"], s)
    return jnp.concatenate(
        [_ref_conv_layer(p["e1"], s),
         _ref_conv_layer(p["e3"], s, padding=(1, 1))], axis=-1)


def _ref_generator(params, x):
    out_c1 = _ref_conv_layer(params["conv1"], x, stride=(1, 2), padding=(1, 1))
    skip = _ref_conv_layer(params["conv1_skip"], x)
    out = maxpool_ceil(out_c1)
    out_f3 = _ref_fire(params["fire3"], _ref_fire(params["fire2"], out))
    out = maxpool_ceil(out_f3)
    out_f5 = _ref_fire(params["fire5"], _ref_fire(params["fire4"], out))
    out = maxpool_ceil(out_f5)
    out = _ref_fire(params["fire9"],
                    _ref_fire(params["fire8"],
                              _ref_fire(params["fire7"],
                                        _ref_fire(params["fire6"], out))))
    out = _ref_fire_deconv(params["fire10"], out) + out_f5
    out = _ref_fire_deconv(params["fire11"], out) + out_f3
    out = _ref_fire_deconv(params["fire12"], out) + out_c1
    out = _ref_fire_deconv(params["fire13"], out) + skip
    y = lax.conv_general_dilated(
        out, params["conv14"]["w"], (1, 1), ((1, 1), (1, 1)),
        dimension_numbers=("NHWC", "OIHW", "NHWC"),
        precision=lax.Precision.HIGHEST)
    return y + params["conv14"]["b"].reshape(1, 1, 1, -1)


# ----------------------------------- main --------------------------------------

if __name__ == "__main__":
    key = jax.random.PRNGKey(0)
    k_layer, k_x, k_p = jax.random.split(key, 3)

    # 1) single Conv+BN+ReLU block at a multi-tile M (exercises the grid-
    #    accumulated stats pass and the parallel streaming pass).
    kx, kw_, kg, kb = jax.random.split(k_layer, 4)
    xs = jax.random.normal(kx, (2, 24, 64, 4), jnp.float32)
    ws = 0.2 * jax.random.normal(kw_, (64, 4, 3, 3), jnp.float32)
    gs = 1.0 + 0.1 * jax.random.normal(kg, (64,), jnp.float32)
    bs = 0.1 * jax.random.normal(kb, (64,), jnp.float32)
    got = jax.block_until_ready(
        conv_bn_relu(xs, ws, gs, bs, stride=(1, 2), padding=(1, 1)))
    want = _ref_conv_layer({"w": ws, "gamma": gs, "beta": bs}, xs,
                           stride=(1, 2), padding=(1, 1))
    assert got.shape == want.shape, (got.shape, want.shape)
    assert jnp.allclose(got, want, rtol=1e-3, atol=1e-3), \
        float(jnp.abs(got - want).max())

    # 2) full SqueezeSegGenerator forward at small shapes.
    N, H, W, CH = 1, 8, 32, 4            # W divisible by 16 for the skip adds
    x = jax.random.normal(k_x, (N, H, W, CH), jnp.float32)
    params = init_params(k_p, CH)

    out = jax.block_until_ready(squeezeseg_generator(params, x))
    assert out.shape == (N, H, W, 1), out.shape
    assert bool(jnp.all(jnp.isfinite(out)))

    ref = _ref_generator(params, x)
    err = float(jnp.abs(out - ref).max())
    assert jnp.allclose(out, ref, rtol=1e-2, atol=1e-2), err

    print("KERNEL_OK")
</pallas_src>

<mosaic_0001>
module attributes {stable_mosaic.version = 11 : i64} {
  func.func @_stats_kernel(%arg0: i32, %arg1: memref<512x128xf32, #tpu.memory_space<vmem>>, %arg2: memref<128x128xf32, #tpu.memory_space<vmem>>, %arg3: memref<1x128xf32, #tpu.memory_space<vmem>>, %arg4: memref<1x128xf32, #tpu.memory_space<vmem>>) attributes {dimension_semantics = [#tpu.dimension_semantics<arbitrary>], iteration_bounds = array<i64: 3>, scalar_prefetch = 0 : i64, scratch_operands = 0 : i64, tpu.core_type = #tpu.core_type<tc>, window_params = [{transform_indices = @transform_0, window_bounds = array<i64: 512, 128>}, {pipeline_mode = #tpu.pipeline_mode<synchronous>, transform_indices = @transform_1, window_bounds = array<i64: 128, 128>}, {pipeline_mode = #tpu.pipeline_mode<synchronous>, transform_indices = @transform_2, window_bounds = array<i64: 1, 128>}, {pipeline_mode = #tpu.pipeline_mode<synchronous>, transform_indices = @transform_3, window_bounds = array<i64: 1, 128>}]} {
    %c0_i32 = arith.constant 0 : i32
    %0 = arith.cmpi eq, %arg0, %c0_i32 : i32
    %1 = arith.extui %0 : i1 to i32
    %c0_i32_0 = arith.constant 0 : i32
    %2 = arith.cmpi ne, %1, %c0_i32_0 : i32
    scf.if %2 {
      %cst_14 = arith.constant 0.000000e+00 : f32
      %17 = vector.broadcast %cst_14 : f32 to vector<1x128xf32>
      %c0_15 = arith.constant 0 : index
      %c0_16 = arith.constant 0 : index
      %18 = vector.load %arg3[%c0_15, %c0_16] : memref<1x128xf32, #tpu.memory_space<vmem>>, vector<1x128xf32>
      tpu.vector_store %arg3[%c0_15, %c0_16], %17 {strides = array<i32>} : memref<1x128xf32, #tpu.memory_space<vmem>>, vector<1x128xf32>,
      %cst_17 = arith.constant 0.000000e+00 : f32
      %19 = vector.broadcast %cst_17 : f32 to vector<1x128xf32>
      %c0_18 = arith.constant 0 : index
      %c0_19 = arith.constant 0 : index
      %20 = vector.load %arg4[%c0_18, %c0_19] : memref<1x128xf32, #tpu.memory_space<vmem>>, vector<1x128xf32>
      tpu.vector_store %arg4[%c0_18, %c0_19], %19 {strides = array<i32>} : memref<1x128xf32, #tpu.memory_space<vmem>>, vector<1x128xf32>,
    } else {
    }
    %c0 = arith.constant 0 : index
    %c0_1 = arith.constant 0 : index
    %3 = vector.load %arg1[%c0, %c0_1] : memref<512x128xf32, #tpu.memory_space<vmem>>, vector<512x128xf32>
    %c0_2 = arith.constant 0 : index
    %c0_3 = arith.constant 0 : index
    %4 = vector.load %arg2[%c0_2, %c0_3] : memref<128x128xf32, #tpu.memory_space<vmem>>, vector<128x128xf32>
    %cst = arith.constant dense<0.000000e+00> : vector<512x128xf32>
    %5 = tpu.matmul %3, %4, %cst {dimension_numbers = #tpu.dot_dimension_numbers<[1], [0], [0], [1], [0, 0, 1, 1], [], []>} : vector<512x128xf32>, vector<128x128xf32>, vector<512x128xf32> -> vector<512x128xf32>
    %c0_4 = arith.constant 0 : index
    %c0_5 = arith.constant 0 : index
    %6 = vector.load %arg3[%c0_4, %c0_5] : memref<1x128xf32, #tpu.memory_space<vmem>>, vector<1x128xf32>
    %cst_6 = arith.constant dense<0.000000e+00> : vector<128xf32>
    %7 = vector.multi_reduction <add>, %5, %cst_6 [0] : vector<512x128xf32> to vector<128xf32>
    %8 = vector.shape_cast %7 : vector<128xf32> to vector<1x128xf32>
    %9 = arith.addf %6, %8 : vector<1x128xf32>
    %c0_7 = arith.constant 0 : index
    %c0_8 = arith.constant 0 : index
    %10 = vector.load %arg3[%c0_7, %c0_8] : memref<1x128xf32, #tpu.memory_space<vmem>>, vector<1x128xf32>
    tpu.vector_store %arg3[%c0_7, %c0_8], %9 {strides = array<i32>} : memref<1x128xf32, #tpu.memory_space<vmem>>, vector<1x128xf32>,
    %c0_9 = arith.constant 0 : index
    %c0_10 = arith.constant 0 : index
    %11 = vector.load %arg4[%c0_9, %c0_10] : memref<1x128xf32, #tpu.memory_space<vmem>>, vector<1x128xf32>
    %12 = arith.mulf %5, %5 : vector<512x128xf32>
    %cst_11 = arith.constant dense<0.000000e+00> : vector<128xf32>
    %13 = vector.multi_reduction <add>, %12, %cst_11 [0] : vector<512x128xf32> to vector<128xf32>
    %14 = vector.shape_cast %13 : vector<128xf32> to vector<1x128xf32>
    %15 = arith.addf %11, %14 : vector<1x128xf32>
    %c0_12 = arith.constant 0 : index
    %c0_13 = arith.constant 0 : index
    %16 = vector.load %arg4[%c0_12, %c0_13] : memref<1x128xf32, #tpu.memory_space<vmem>>, vector<1x128xf32>
    tpu.vector_store %arg4[%c0_12, %c0_13], %15 {strides = array<i32>} : memref<1x128xf32, #tpu.memory_space<vmem>>, vector<1x128xf32>,
    return
  }
  func.func @transform_0(%arg0: i32) -> (i32, i32) {
    %c0_i32 = arith.constant 0 : i32
    %c0_i32_0 = arith.constant 0 : i32
    return %arg0, %c0_i32 : i32, i32
  }
  func.func @transform_1(%arg0: i32) -> (i32, i32) {
    %c0_i32 = arith.constant 0 : i32
    %c0_i32_0 = arith.constant 0 : i32
    %c0_i32_1 = arith.constant 0 : i32
    return %c0_i32, %c0_i32_0 : i32, i32
  }
  func.func @transform_2(%arg0: i32) -> (i32, i32) {
    %c0_i32 = arith.constant 0 : i32
    %c0_i32_0 = arith.constant 0 : i32
    %c0_i32_1 = arith.constant 0 : i32
    return %c0_i32, %c0_i32_0 : i32, i32
  }
  func.func @transform_3(%arg0: i32) -> (i32, i32) {
    %c0_i32 = arith.constant 0 : i32
    %c0_i32_0 = arith.constant 0 : i32
    %c0_i32_1 = arith.constant 0 : i32
    return %c0_i32, %c0_i32_0 : i32, i32
  }
}

</mosaic_0001>

<bundles_post_ra>
// kernel: _run_stats.1
= control target key start
LH: loop header
LB: loop body
LE: loop exit
PB: predicated region body
PF: predicated region fallthrough
CT: control target
= control target key end

     0   :  { %9 = vsyncpa [#allocation3], 0  ;;  %s1911_s0 = inlined_call_operand.hbm [shape: f32[1536,128], index: 0, kind: input, shape index: {}]   ;;  %s1912_s1 = inlined_call_operand.hbm [shape: f32[128,128], index: 1, kind: input, shape index: {}]   ;;  %s1913_s2 = inlined_call_operand.hbm [shape: f32[1,128], index: 2, kind: output, shape index: {0}]   ;;  %s1914_s3 = inlined_call_operand.hbm [shape: f32[1,128], index: 3, kind: output, shape index: {1}]  }
   0x1   :  { %11 = vsyncpa [#allocation3 + $0x1], 0 }
   0x2   :  { %12 = vsyncpa [#allocation6], 0 }
   0x3   :  { %13 = vsyncpa [#allocation4], 0 }
   0x4   :  { %14 = vsyncpa [#allocation9], 0  ;;  %s1486_s12 = smov 0   ;;  %s1488_s13 = smov 0  }
   0x5   :  { %s1490_s14 = smov 0   ;;  %s1492_s15 = smov 0  }
   0x6 LB: > { %s1505_s16 = sadd.s32 4294967295, %s1457_s15   ;;  %p40_p0 = scmp.ne.s32.totalorder %s1449_s13, %s1445_s12  ;;  %s1457_s15 = sphi %s1492_s15, %s1930_s15   ;;  %s1453_s14 = sphi %s1490_s14, %s1929_s14   ;;  %s1449_s13 = sphi %s1488_s13, %s1928_s13   ;;  %s1445_s12 = sphi %s1486_s12, %s1927_s12  }
   0x7   : > { %p1915_p1 = scmp.eq.s32.totalorder %s1505_s16, 0  ;;  %p961_p2 = scmp.ge.s32.totalorder %s1457_s15, 1 }
   0x8   : > { %p114_p3 = scmp.lt.s32.totalorder %s1457_s15, 4  ;;  %s1459_s19 = smov [#allocation5]  }
   0x9   : > { %p1514_p5 = por %p1915_p1, %p40_p0  ;;  %s126_s20 = sshll.u32 %s1459_s19, 4  ;;  %s127_s20 = int_to_ptr.vmem [resolvable:$true] %s126_s20 }
   0xa   : > { %p1518_p6 = pnand %p961_p2, %p114_p3  ;;  %s1531_s22 = sadd.s32 1, %s1457_s15  }
   0xb   : > { %s1918_s17 = scalar_select %p1514_p5, 1, 0 }
   0xc   : > { %s1919_s18 = scalar_select %p1518_p6, 1, 0 }
   0xd   : > { %p1248_p7 = pneg %p1518_p6  ;;  %s27_s23 = sadd.s32 1, %s1453_s14 }
   0xe   : > { %s24_s24 = ssub.s32 %s1457_s15, %s1531_s22  ;;  %s1301_s27 = scalar_lea.hbm %s1912_s1, 2048 }
   0xf   : > { %p1526_p8 = pnand %p1248_p7, %p1915_p1  ;;  %p1302_p9 = scmp.ne.s32.totalorder %s1912_s1, %s1301_s27 }
  0x10   : > { %p1308_p13 = scmp.lt.u32.totalorder %s1301_s27, %s1912_s1 }
  0x11   : > { %p1303_p10 = pneg %p1526_p8 }
  0x13   : > { %p1304_p11 = pnand %p1303_p10, %p1302_p9 }
  0x15   : > { %p1305_p12 = pneg %p1304_p11 }
  0x17   : > { %p1310_p0 = pnand %p1308_p13, %p1305_p12 }
  0x19   : > { %1313 = shalt.err (!%p1310_p0)
}
  0x1a   : > { %s1314_s5 = scalar_lea.vmem %s127_s20, 2048  ;;  %p1322_p4 = scmp.lt.s32.totalorder %s127_s20, %s127_s20 }
  0x1b   : > { %p1315_p2 = scmp.ne.s32.totalorder %s127_s20, %s1314_s5  ;;  %p1323_p1 = scmp.lt.s32.totalorder %s1314_s5, %s1314_s5 }
  0x1d   : > { %p1317_p3 = pnand %p1315_p2, %p1303_p10  ;;  %p1324_p5 = por %p1323_p1, %p1322_p4 }
  0x1f   : > { %p1318_p7 = pneg %p1317_p3 }
  0x21   : > { %p1325_p6 = pnand %p1324_p5, %p1318_p7 }
  0x23   : > { %1328 = shalt.err (!%p1325_p6)
}
  0x24   : > { %s1460_s6 = smov 128   ;;  %s1461_s7 = smov 8  }
  0x25   : > { %1251 = dma.hbm_to_vmem [thread:$0]  (!%p1526_p8), %s1912_s1, 2048, %s127_s20, [#allocation6], %s1460_s6, %s1460_s6, %s1461_s7  }
  0x26   : > { %p25_p1 = scmp.eq.s32.totalorder %s24_s24, 0  ;;  %p34_p4 = scmp.ne.s32.totalorder %s1453_s14, %s1449_s13 }
  0x27   : > { %p35_p5 = scmp.eq.s32.totalorder %s1457_s15, 0  ;;  %p1257_p6 = scmp.lt.s32.totalorder %s1457_s15, 3 }
  0x28   : > { %s1560_s10 = scalar_select %p25_p1, %s1453_s14, %s27_s23  }
  0x29   : > { %p36_p9 = por %p35_p5, %p34_p4  ;;  %s140_s11 = sand.u32 1, %s1453_s14  }
  0x2a   : > { %s964_s12 = sshll.u32 %s140_s11, 9  ;;  %s977_s19 = sshll.u32 %s1457_s15, 13 }
  0x2b   : > { %s1567_s21 = scalar_lea.hbm %s1911_s0, %s977_s19  ;;  %s144_s20 = scalar_lea.vmem [#allocation2], %s964_s12 }
  0x2c   : > { %s151_s24 = sshll.u32 %s144_s20, 4  ;;  %p1571_p8 = pnand %p1257_p6, %p36_p9  ;;  %s1569_s24 = int_to_ptr.vmem [resolvable:$true] %s151_s24 }
  0x2d   : > { %s1575_s15 = scalar_lea.sflag [#allocation3], %s140_s11  ;;  %s1329_s27 = scalar_lea.hbm %s1567_s21, 8192 }
  0x2e   : > { %p1330_p10 = scmp.ne.s32.totalorder %s1567_s21, %s1329_s27  ;;  %p1331_p11 = pneg %p1571_p8 }
  0x2f   : > { %s1334_s30 = scalar_lea.hbm %s1911_s0, 24576  ;;  %p1335_p0 = scmp.lt.u32.totalorder %s1567_s21, %s1911_s0 }
  0x30   : > { %p1332_p12 = pnand %p1331_p11, %p1330_p10  ;;  %p1336_p2 = scmp.lt.u32.totalorder %s1334_s30, %s1329_s27 }
  0x31   : > { %p1338_p7 = scmp.lt.u32.totalorder %s1329_s27, %s1567_s21 }
  0x32   : > { %p1333_p13 = pneg %p1332_p12  ;;  %p1337_p3 = por %p1336_p2, %p1335_p0 }
  0x34   : > { %p1339_p1 = por %p1338_p7, %p1337_p3 }
  0x36   : > { %p1340_p4 = pnand %p1339_p1, %p1333_p13 }
  0x38   : > { %1343 = shalt.err (!%p1340_p4)
}
  0x39   : > { %s1344_s8 = scalar_lea.vmem %s1569_s24, 8192  ;;  %s1462_s9 = smov [#allocation2]  }
  0x3a   : > { %p1345_p5 = scmp.ne.s32.totalorder %s1569_s24, %s1344_s8  ;;  %s1349_s11 = sshll.u32 %s1462_s9, 4  ;;  %s1350_s11 = int_to_ptr.vmem [resolvable:$false] %s1349_s11 }
  0x3b   : > { %s1351_s12 = scalar_lea.vmem %s1350_s11, 16384  ;;  %p1352_p10 = scmp.lt.s32.totalorder %s1569_s24, %s1350_s11 }
  0x3c   : > { %p1347_p6 = pnand %p1345_p5, %p1331_p11  ;;  %p1353_p12 = scmp.lt.s32.totalorder %s1351_s12, %s1344_s8 }
  0x3e   : > { %p1348_p9 = pneg %p1347_p6  ;;  %p1354_p0 = por %p1353_p12, %p1352_p10 }
  0x40   : > { %p1355_p2 = pnand %p1354_p0, %p1348_p9 }
  0x42   : > { %1358 = shalt.err (!%p1355_p2)
}
  0x43   : > { %1255 = dma.hbm_to_vmem [thread:$0]  (!%p1571_p8), %s1567_s21, 8192, %s1569_s24, %s1575_s15, %s1460_s6, %s1460_s6, %s1461_s7  }
  0x44   : > { %p1922_p11 = scmp.ne.s32.totalorder %s1919_s18, 0 }
  0x45   : > { %s165_s19 = sand.u32 (!%p1922_p11), 1, %s1449_s13   ;;  %p1923_p13 = scmp.ne.s32.totalorder (!%p1922_p11), %s1918_s17, 0 }
  0x46   : > { %163 = sbr.rel (%p1922_p11) target bundleno = 518 (0x206), region = 28  ;;  %s968_s25 = sshll.u32 (!%p1922_p11), %s165_s19, 9 }
  0x47   : > { %s166_s26 = scalar_lea.sflag (!%p1922_p11), [#allocation3], %s165_s19  ;;  %s1609_s20 = scalar_lea.vmem (!%p1922_p11), [#allocation2], %s968_s25 }
  0x4d   : > { %1428 = dma.done.wait (%p1923_p13), %s166_s26, 8192  }
  0x4e   : > { %1430 = vsyncadd (%p1923_p13), %s166_s26, 4294959104  ;;  %p1924_p3 = scmp.eq.s32.totalorder %s1505_s16, 0 }
  0x50   : > { %1432 = dma.done.wait (%p1924_p3), [#allocation6], 2048   ;;  %p1925_p8 = pmov %p1924_p3 }
  0x51   : > { %p1926_p7 = scmp.ne.s32.totalorder %s1505_s16, 0 }
  0x52   : > { %1434 = vsyncadd (%p1925_p8), [#allocation6], 4294965248  ;;  %v1463_v0 = vmov (!%p1926_p7), 0.0  }
  0x53   : > { %195 = sbr.rel (%p1926_p7) target bundleno = 90 (0x5a), region = 40  ;;  %196 = vst [vmem:[#allocation7] sm:$0x1] (!%p1926_p7), %v1463_v0  ;;  %197 = vst [vmem:[#allocation8] sm:$0x1] (!%p1926_p7), %v1463_v0 }
  0x5a PF: > { %v262_v1 = vld [vmem:[#allocation5] sm:$0xff]  ;;  %v263_v2 = vld [vmem:[#allocation5 + $0x8] sm:$0xff]  ;;  %v264_v3 = vld [vmem:[#allocation5 + $0x10] sm:$0xff]  ;;  %s1464_s17 = smov [#allocation7]   ;;  %p1259_p1 = scmp.eq.s32.totalorder %s1505_s16, 2 }
  0x5b   : > { %v1186_v4 = vpack.c.bf16 %v263_v2, %v262_v1  ;;  %v265_v5 = vld [vmem:[#allocation5 + $0x18] sm:$0xff]  ;;  %v266_v7 = vld [vmem:[#allocation5 + $0x20] sm:$0xff]  ;;  %v267_v8 = vld [vmem:[#allocation5 + $0x28] sm:$0xff]  ;;  %s878_s18 = sshll.u32 %s1464_s17, 4  ;;  %s1465_s6 = smov [#allocation8]   ;;  %s879_s18 = int_to_ptr.vmem [resolvable:$true] %s878_s18 }
  0x5c   : > { %v1190_v6 = vpack.c.bf16 %v265_v5, %v264_v3  ;;  %v1194_v9 = vpack.c.bf16 %v267_v8, %v266_v7  ;;  %v198_v10 = vld [vmem:[%s1609_s20] sm:$0xff]  ;;  %v268_v11 = vld [vmem:[#allocation5 + $0x30] sm:$0xff]  ;;  %v269_v12 = vld [vmem:[#allocation5 + $0x38] sm:$0xff]  ;;  %s889_s7 = sshll.u32 %s1465_s6, 4  ;;  %s1359_s21 = scalar_lea.vmem %s879_s18, 16  ;;  %s1846_s7 = int_to_ptr.vmem [resolvable:$true] %s889_s7 }
  0x5d   : > { %1187 = vmatprep.subr.bf16.mxu0 %v1186_v4  ;;  %1218 = vmatprep.subr.bf16.mxu1 %v1186_v4  ;;  %v1198_v13 = vpack.c.bf16 %v269_v12, %v268_v11  ;;  %v270_v14 = vld [vmem:[#allocation5 + $0x40] sm:$0xff]  ;;  %v271_v15 = vld [vmem:[#allocation5 + $0x48] sm:$0xff]  ;;  %v272_v17 = vld [vmem:[#allocation5 + $0x50] sm:$0xff]  ;;  %p1360_p4 = scmp.ne.s32.totalorder %s879_s18, %s1359_s21  ;;  %s1365_s24 = scalar_lea.vmem %s879_s18, 32 }
  0x5e   : > { %1189 = vmatpush3.bf16.msra.mxu0 %v1186_v4  ;;  %1226 = vmatpush3.bf16.msra.mxu1 %v1186_v4  ;;  %v1202_v16 = vpack.c.bf16 %v271_v15, %v270_v14  ;;  %v273_v18 = vld [vmem:[#allocation5 + $0x58] sm:$0xff]  ;;  %v230_v19 = vld [vmem:[%s1609_s20 + $0x100] sm:$0xff]  ;;  %v275_v22 = vld [vmem:[#allocation5 + $0x68] sm:$0xff]  ;;  %p1366_p9 = scmp.lt.s32.totalorder %s879_s18, %s879_s18  ;;  %p1367_p10 = scmp.lt.s32.totalorder %s1365_s24, %s1359_s21 }
  0x5f   : > { %1191 = vmatprep.subr.bf16.mxu0 %v1190_v6  ;;  %1219 = vmatprep.subr.bf16.mxu1 %v1190_v6  ;;  %v1206_v20 = vpack.c.bf16 %v273_v18, %v272_v17  ;;  %v274_v21 = vld [vmem:[#allocation5 + $0x60] sm:$0xff]  ;;  %v276_v24 = vld [vmem:[#allocation5 + $0x70] sm:$0xff]  ;;  %v277_v25 = vld [vmem:[#allocation5 + $0x78] sm:$0xff]  ;;  %p1361_p5 = pnand %p1360_p4, %p1259_p1 }
  0x60   : > { %1090 = vmatprep.mubr.f32.mxu0 %v198_v10  ;;  %1138 = vmatprep.mubr.f32.mxu1 %v230_v19  ;;  %v1210_v23 = vpack.c.bf16 %v275_v22, %v274_v21  ;;  %v1214_v26 = vpack.c.bf16 %v277_v25, %v276_v24  ;;  %v199_v27 = vld [vmem:[%s1609_s20 + $0x8] sm:$0xff]  ;;  %v200_v29 = vld [vmem:[%s1609_s20 + $0x10] sm:$0xff]  ;;  %v201_v31 = vld [vmem:[%s1609_s20 + $0x18] sm:$0xff]  ;;  %p1368_p12 = por %p1367_p10, %p1366_p9 }
  0x61   : > { %v231_v28 = vld [vmem:[%s1609_s20 + $0x108] sm:$0xff]  ;;  %v232_v30 = vld [vmem:[%s1609_s20 + $0x110] sm:$0xff]  ;;  %v233_v32 = vld [vmem:[%s1609_s20 + $0x118] sm:$0xff]  ;;  %p1362_p6 = pneg %p1361_p5 }
  0x62   : > { %1193 = vmatpush3.bf16.msra.mxu0 %v1190_v6  ;;  %1227 = vmatpush3.bf16.msra.mxu1 %v1190_v6  ;;  %v202_v33 = vld [vmem:[%s1609_s20 + $0x20] sm:$0xff]  ;;  %v203_v35 = vld [vmem:[%s1609_s20 + $0x28] sm:$0xff]  ;;  %v204_v37 = vld [vmem:[%s1609_s20 + $0x30] sm:$0xff] }
  0x63   : > { %1195 = vmatprep.subr.bf16.mxu0 %v1194_v9  ;;  %1220 = vmatprep.subr.bf16.mxu1 %v1194_v9  ;;  %v234_v34 = vld [vmem:[%s1609_s20 + $0x120] sm:$0xff]  ;;  %v235_v36 = vld [vmem:[%s1609_s20 + $0x128] sm:$0xff]  ;;  %v236_v38 = vld [vmem:[%s1609_s20 + $0x130] sm:$0xff]  ;;  %p1369_p0 = pnand %p1368_p12, %p1362_p6 }
  0x64   : > { %v205_v39 = vld [vmem:[%s1609_s20 + $0x38] sm:$0xff]  ;;  %v206_v41 = vld [vmem:[%s1609_s20 + $0x40] sm:$0xff]  ;;  %v207_v43 = vld [vmem:[%s1609_s20 + $0x48] sm:$0xff] }
  0x65   : > { %v237_v40 = vld [vmem:[%s1609_s20 + $0x138] sm:$0xff]  ;;  %v238_v42 = vld [vmem:[%s1609_s20 + $0x140] sm:$0xff]  ;;  %v239_v44 = vld [vmem:[%s1609_s20 + $0x148] sm:$0xff] }
  0x66   : > { %1197 = vmatpush3.bf16.msra.mxu0 %v1194_v9  ;;  %1228 = vmatpush3.bf16.msra.mxu1 %v1194_v9  ;;  %v208_v45 = vld [vmem:[%s1609_s20 + $0x50] sm:$0xff]  ;;  %v209_v47 = vld [vmem:[%s1609_s20 + $0x58] sm:$0xff]  ;;  %v210_v49 = vld [vmem:[%s1609_s20 + $0x60] sm:$0xff] }
  0x67   : > { %1199 = vmatprep.subr.bf16.mxu0 %v1198_v13  ;;  %1221 = vmatprep.subr.bf16.mxu1 %v1198_v13  ;;  %v240_v46 = vld [vmem:[%s1609_s20 + $0x150] sm:$0xff]  ;;  %v241_v48 = vld [vmem:[%s1609_s20 + $0x158] sm:$0xff]  ;;  %v242_v50 = vld [vmem:[%s1609_s20 + $0x160] sm:$0xff] }
  0x68   : > { %v211_v51 = vld [vmem:[%s1609_s20 + $0x68] sm:$0xff]  ;;  %v212_v53 = vld [vmem:[%s1609_s20 + $0x70] sm:$0xff]  ;;  %v213_v55 = vld [vmem:[%s1609_s20 + $0x78] sm:$0xff] }
  0x69   : > { %v243_v52 = vld [vmem:[%s1609_s20 + $0x168] sm:$0xff]  ;;  %v244_v54 = vld [vmem:[%s1609_s20 + $0x170] sm:$0xff]  ;;  %v245_v56 = vld [vmem:[%s1609_s20 + $0x178] sm:$0xff] }
  0x6a   : > { %1201 = vmatpush3.bf16.msra.mxu0 %v1198_v13  ;;  %1229 = vmatpush3.bf16.msra.mxu1 %v1198_v13  ;;  %v214_v57 = vld [vmem:[%s1609_s20 + $0x80] sm:$0xff]  ;;  %v215_v59 = vld [vmem:[%s1609_s20 + $0x88] sm:$0xff]  ;;  %v216_v61 = vld [vmem:[%s1609_s20 + $0x90] sm:$0xff] }
  0x6b   : > { %1203 = vmatprep.subr.bf16.mxu0 %v1202_v16  ;;  %1222 = vmatprep.subr.bf16.mxu1 %v1202_v16  ;;  %v246_v58 = vld [vmem:[%s1609_s20 + $0x180] sm:$0xff]  ;;  %v247_v60 = vld [vmem:[%s1609_s20 + $0x188] sm:$0xff]  ;;  %v248_v62 = vld [vmem:[%s1609_s20 + $0x190] sm:$0xff] }
  0x6c   : > { %v217_v63 = vld [vmem:[%s1609_s20 + $0x98] sm:$0xff]  ;;  %v218_v1 = vld [vmem:[%s1609_s20 + $0xa0] sm:$0xff]  ;;  %v219_v3 = vld [vmem:[%s1609_s20 + $0xa8] sm:$0xff] }
  0x6d   : > { %v249_v0 = vld [vmem:[%s1609_s20 + $0x198] sm:$0xff]  ;;  %v250_v2 = vld [vmem:[%s1609_s20 + $0x1a0] sm:$0xff]  ;;  %v251_v4 = vld [vmem:[%s1609_s20 + $0x1a8] sm:$0xff] }
  0x6e   : > { %1205 = vmatpush3.bf16.msra.mxu0 %v1202_v16  ;;  %1230 = vmatpush3.bf16.msra.mxu1 %v1202_v16  ;;  %v220_v5 = vld [vmem:[%s1609_s20 + $0xb0] sm:$0xff]  ;;  %v221_v7 = vld [vmem:[%s1609_s20 + $0xb8] sm:$0xff]  ;;  %v222_v9 = vld [vmem:[%s1609_s20 + $0xc0] sm:$0xff] }
  0x6f   : > { %1207 = vmatprep.subr.bf16.mxu0 %v1206_v20  ;;  %1223 = vmatprep.subr.bf16.mxu1 %v1206_v20  ;;  %v252_v6 = vld [vmem:[%s1609_s20 + $0x1b0] sm:$0xff]  ;;  %v253_v8 = vld [vmem:[%s1609_s20 + $0x1b8] sm:$0xff]  ;;  %v254_v10 = vld [vmem:[%s1609_s20 + $0x1c0] sm:$0xff] }
  0x70   : > { %v223_v11 = vld [vmem:[%s1609_s20 + $0xc8] sm:$0xff]  ;;  %v224_v13 = vld [vmem:[%s1609_s20 + $0xd0] sm:$0xff]  ;;  %v225_v15 = vld [vmem:[%s1609_s20 + $0xd8] sm:$0xff] }
  0x71   : > { %v255_v12 = vld [vmem:[%s1609_s20 + $0x1c8] sm:$0xff]  ;;  %v256_v14 = vld [vmem:[%s1609_s20 + $0x1d0] sm:$0xff]  ;;  %v257_v16 = vld [vmem:[%s1609_s20 + $0x1d8] sm:$0xff] }
  0x72   : > { %1209 = vmatpush3.bf16.msra.mxu0 %v1206_v20  ;;  %1231 = vmatpush3.bf16.msra.mxu1 %v1206_v20  ;;  %v226_v17 = vld [vmem:[%s1609_s20 + $0xe0] sm:$0xff]  ;;  %v227_v19 = vld [vmem:[%s1609_s20 + $0xe8] sm:$0xff]  ;;  %v228_v21 = vld [vmem:[%s1609_s20 + $0xf0] sm:$0xff] }
  0x73   : > { %1211 = vmatprep.subr.bf16.mxu0 %v1210_v23  ;;  %1224 = vmatprep.subr.bf16.mxu1 %v1210_v23  ;;  %v258_v18 = vld [vmem:[%s1609_s20 + $0x1e0] sm:$0xff]  ;;  %v259_v20 = vld [vmem:[%s1609_s20 + $0x1e8] sm:$0xff]  ;;  %v260_v22 = vld [vmem:[%s1609_s20 + $0x1f0] sm:$0xff] }
  0x74   : > { %v261_v24 = vld [vmem:[%s1609_s20 + $0x1f8] sm:$0xff] }
  0x76   : > { %1213 = vmatpush3.bf16.msra.mxu0 %v1210_v23  ;;  %1232 = vmatpush3.bf16.msra.mxu1 %v1210_v23  ;;  %v229_v23 = vld [vmem:[%s1609_s20 + $0xf8] sm:$0xff] }
  0x77   : > { %1215 = vmatprep.subr.bf16.mxu0 %v1214_v26  ;;  %1225 = vmatprep.subr.bf16.mxu1 %v1214_v26 }
  0x7a   : > { %1217 = vmatpush3.bf16.msra.mxu0 %v1214_v26  ;;  %1233 = vmatpush3.bf16.msra.mxu1 %v1214_v26 }
  0x7d   : > { %1091 = vmatmul.mubr.f32.vlgmr.msra.gmra.mrb[0].mxu0 %v199_v27  ;;  %1139 = vmatmul.mubr.f32.vlgmr.msra.gmra.mrb[0].mxu1 %v231_v28 }
  0x7e   : > { %1093 = vmatprep.mubr.f32.mxu0 %v200_v29  ;;  %1141 = vmatprep.mubr.f32.mxu1 %v232_v30 }
  0x81   : > { %1094 = vmatmul.mubr.f32.gmra.mrb[2].mxu0 %v201_v31  ;;  %1142 = vmatmul.mubr.f32.gmra.mrb[2].mxu1 %v233_v32 }
  0x82   : > { %1096 = vmatprep.mubr.f32.mxu0 %v202_v33  ;;  %1144 = vmatprep.mubr.f32.mxu1 %v234_v34 }
  0x85   : > { %1097 = vmatmul.mubr.f32.gmra.mrb[4].mxu0 %v203_v35  ;;  %1145 = vmatmul.mubr.f32.gmra.mrb[4].mxu1 %v235_v36 }
  0x86   : > { %1099 = vmatprep.mubr.f32.mxu0 %v204_v37  ;;  %1147 = vmatprep.mubr.f32.mxu1 %v236_v38 }
  0x89   : > { %1100 = vmatmul.mubr.f32.gmra.mrb[6].mxu0 %v205_v39  ;;  %1148 = vmatmul.mubr.f32.gmra.mrb[6].mxu1 %v237_v40 }
  0x8a   : > { %1102 = vmatprep.mubr.f32.mxu0 %v206_v41  ;;  %1150 = vmatprep.mubr.f32.mxu1 %v238_v42 }
  0x8d   : > { %1103 = vmatmul.mubr.f32.gmra.mrb[8].mxu0 %v207_v43  ;;  %1151 = vmatmul.mubr.f32.gmra.mrb[8].mxu1 %v239_v44 }
  0x8e   : > { %1105 = vmatprep.mubr.f32.mxu0 %v208_v45  ;;  %1153 = vmatprep.mubr.f32.mxu1 %v240_v46 }
  0x91   : > { %1106 = vmatmul.mubr.f32.gmra.mrb[10].mxu0 %v209_v47  ;;  %1154 = vmatmul.mubr.f32.gmra.mrb[10].mxu1 %v241_v48 }
  0x92   : > { %1108 = vmatprep.mubr.f32.mxu0 %v210_v49  ;;  %1156 = vmatprep.mubr.f32.mxu1 %v242_v50 }
  0x95   : > { %1109 = vmatmul.mubr.f32.gmra.mrb[12].mxu0 %v211_v51  ;;  %1157 = vmatmul.mubr.f32.gmra.mrb[12].mxu1 %v243_v52 }
  0x96   : > { %1111 = vmatprep.mubr.f32.mxu0 %v212_v53  ;;  %1159 = vmatprep.mubr.f32.mxu1 %v244_v54 }
  0x99   : > { %1112 = vmatmul.mubr.f32.gmra.mrb[14].mxu0 %v213_v55  ;;  %1160 = vmatmul.mubr.f32.gmra.mrb[14].mxu1 %v245_v56 }
  0x9a   : > { %1114 = vmatprep.mubr.f32.mxu0 %v214_v57  ;;  %1162 = vmatprep.mubr.f32.mxu1 %v246_v58 }
  0x9d   : > { %1115 = vmatmul.mubr.f32.gmra.mrb[16].mxu0 %v215_v59  ;;  %1163 = vmatmul.mubr.f32.gmra.mrb[16].mxu1 %v247_v60 }
  0x9e   : > { %1117 = vmatprep.mubr.f32.mxu0 %v216_v61  ;;  %1165 = vmatprep.mubr.f32.mxu1 %v248_v62 }
  0xa1   : > { %1118 = vmatmul.mubr.f32.gmra.mrb[18].mxu0 %v217_v63  ;;  %1166 = vmatmul.mubr.f32.gmra.mrb[18].mxu1 %v249_v0 }
  0xa2   : > { %1120 = vmatprep.mubr.f32.mxu0 %v218_v1  ;;  %1168 = vmatprep.mubr.f32.mxu1 %v250_v2 }
  0xa5   : > { %1121 = vmatmul.mubr.f32.gmra.mrb[20].mxu0 %v219_v3  ;;  %1169 = vmatmul.mubr.f32.gmra.mrb[20].mxu1 %v251_v4 }
  0xa6   : > { %1123 = vmatprep.mubr.f32.mxu0 %v220_v5  ;;  %1171 = vmatprep.mubr.f32.mxu1 %v252_v6 }
  0xa9   : > { %1124 = vmatmul.mubr.f32.gmra.mrb[22].mxu0 %v221_v7  ;;  %1172 = vmatmul.mubr.f32.gmra.mrb[22].mxu1 %v253_v8 }
  0xaa   : > { %1126 = vmatprep.mubr.f32.mxu0 %v222_v9  ;;  %1174 = vmatprep.mubr.f32.mxu1 %v254_v10 }
  0xad   : > { %1127 = vmatmul.mubr.f32.gmra.mrb[24].mxu0 %v223_v11  ;;  %1175 = vmatmul.mubr.f32.gmra.mrb[24].mxu1 %v255_v12 }
  0xae   : > { %1129 = vmatprep.mubr.f32.mxu0 %v224_v13  ;;  %1177 = vmatprep.mubr.f32.mxu1 %v256_v14 }
  0xb1   : > { %1130 = vmatmul.mubr.f32.gmra.mrb[26].mxu0 %v225_v15  ;;  %1178 = vmatmul.mubr.f32.gmra.mrb[26].mxu1 %v257_v16 }
  0xb2   : > { %1132 = vmatprep.mubr.f32.mxu0 %v226_v17  ;;  %1180 = vmatprep.mubr.f32.mxu1 %v258_v18 }
  0xb5   : > { %1133 = vmatmul.mubr.f32.gmra.mrb[28].mxu0 %v227_v19  ;;  %1181 = vmatmul.mubr.f32.gmra.mrb[28].mxu1 %v259_v20 }
  0xb6   : > { %1135 = vmatprep.mubr.f32.mxu0 %v228_v21  ;;  %1183 = vmatprep.mubr.f32.mxu1 %v260_v22 }
  0xb9   : > { %1136 = vmatmul.mubr.f32.gmra.mrb[30].mxu0 %v229_v23  ;;  %1184 = vmatmul.mubr.f32.gmra.mrb[30].mxu1 %v261_v24 }
 0x150   : > { %v1092_v25 = vpop.f32.mrb[0].mxu0  ;;  %v1685_v26 = vpop.f32.mrb[0].mxu1 }
 0x151   : > { %v737_v27 = vmul.f32 %v1092_v25, %v1092_v25  ;;  %v344_v28 = vpop.f32.mrb[1].mxu0  ;;  %v1687_v29 = vpop.f32.mrb[1].mxu1 }
 0x152   : > { %v664_v30 = vadd.f32 %v1092_v25, %v344_v28  ;;  %v736_v31 = vmul.f32 %v344_v28, %v344_v28 }
 0x154   : > { %v800_v32 = vadd.f32 %v737_v27, %v736_v31  ;;  %v1095_v33 = vpop.f32.mrb[2].mxu0  ;;  %v1689_v34 = vpop.f32.mrb[2].mxu1 }
 0x155   : > { %v354_v35 = vpop.f32.mrb[3].mxu0  ;;  %v1691_v36 = vpop.f32.mrb[3].mxu1  ;;  %v739_v39 = vmul.f32 %v1095_v33, %v1095_v33 }
 0x156   : > { %v665_v37 = vadd.f32 %v664_v30, %v354_v35  ;;  %v738_v38 = vmul.f32 %v354_v35, %v354_v35 }
 0x158   : > { %v801_v40 = vadd.f32 %v800_v32, %v738_v38  ;;  %v1098_v41 = vpop.f32.mrb[4].mxu0  ;;  %v666_v42 = vadd.f32 %v1095_v33, %v665_v37  ;;  %v1693_v43 = vpop.f32.mrb[4].mxu1 }
 0x159   : > { %v364_v44 = vpop.f32.mrb[5].mxu0  ;;  %v1695_v45 = vpop.f32.mrb[5].mxu1  ;;  %v741_v49 = vmul.f32 %v1098_v41, %v1098_v41 }
 0x15a   : > { %v667_v46 = vadd.f32 %v666_v42, %v364_v44  ;;  %v740_v47 = vmul.f32 %v364_v44, %v364_v44  ;;  %v802_v48 = vadd.f32 %v801_v40, %v739_v39 }
 0x15c   : > { %v803_v50 = vadd.f32 %v802_v48, %v740_v47  ;;  %v1101_v51 = vpop.f32.mrb[6].mxu0  ;;  %v668_v52 = vadd.f32 %v1098_v41, %v667_v46  ;;  %v1697_v53 = vpop.f32.mrb[6].mxu1 }
 0x15d   : > { %v374_v54 = vpop.f32.mrb[7].mxu0  ;;  %v1699_v55 = vpop.f32.mrb[7].mxu1  ;;  %v743_v59 = vmul.f32 %v1101_v51, %v1101_v51 }
 0x15e   : > { %v669_v56 = vadd.f32 %v668_v52, %v374_v54  ;;  %v742_v57 = vmul.f32 %v374_v54, %v374_v54  ;;  %v804_v58 = vadd.f32 %v803_v50, %v741_v49 }
 0x160   : > { %v805_v60 = vadd.f32 %v804_v58, %v742_v57  ;;  %v1104_v61 = vpop.f32.mrb[8].mxu0  ;;  %v670_v62 = vadd.f32 %v1101_v51, %v669_v56  ;;  %v1701_v63 = vpop.f32.mrb[8].mxu1 }
 0x161   : > { %v384_v0 = vpop.f32.mrb[9].mxu0  ;;  %v1703_v1 = vpop.f32.mrb[9].mxu1  ;;  %v745_v5 = vmul.f32 %v1104_v61, %v1104_v61 }
 0x162   : > { %v671_v2 = vadd.f32 %v670_v62, %v384_v0  ;;  %v744_v3 = vmul.f32 %v384_v0, %v384_v0  ;;  %v806_v4 = vadd.f32 %v805_v60, %v743_v59 }
 0x164   : > { %v807_v6 = vadd.f32 %v806_v4, %v744_v3  ;;  %v1107_v7 = vpop.f32.mrb[10].mxu0  ;;  %v672_v8 = vadd.f32 %v1104_v61, %v671_v2  ;;  %v1705_v9 = vpop.f32.mrb[10].mxu1 }
 0x165   : > { %v394_v10 = vpop.f32.mrb[11].mxu0  ;;  %v1707_v11 = vpop.f32.mrb[11].mxu1  ;;  %v747_v15 = vmul.f32 %v1107_v7, %v1107_v7 }
 0x166   : > { %v673_v12 = vadd.f32 %v672_v8, %v394_v10  ;;  %v746_v13 = vmul.f32 %v394_v10, %v394_v10  ;;  %v808_v14 = vadd.f32 %v807_v6, %v745_v5 }
 0x168   : > { %v809_v16 = vadd.f32 %v808_v14, %v746_v13  ;;  %v1110_v17 = vpop.f32.mrb[12].mxu0  ;;  %v674_v18 = vadd.f32 %v1107_v7, %v673_v12  ;;  %v1709_v19 = vpop.f32.mrb[12].mxu1 }
 0x169   : > { %v404_v20 = vpop.f32.mrb[13].mxu0  ;;  %v1711_v21 = vpop.f32.mrb[13].mxu1  ;;  %v749_v25 = vmul.f32 %v1110_v17, %v1110_v17 }
 0x16a   : > { %v675_v22 = vadd.f32 %v674_v18, %v404_v20  ;;  %v748_v23 = vmul.f32 %v404_v20, %v404_v20  ;;  %v810_v24 = vadd.f32 %v809_v16, %v747_v15 }
 0x16c   : > { %v811_v27 = vadd.f32 %v810_v24, %v748_v23  ;;  %v1113_v28 = vpop.f32.mrb[14].mxu0  ;;  %v676_v30 = vadd.f32 %v1110_v17, %v675_v22  ;;  %v1713_v31 = vpop.f32.mrb[14].mxu1 }
 0x16d   : > { %v414_v32 = vpop.f32.mrb[15].mxu0  ;;  %v1715_v33 = vpop.f32.mrb[15].mxu1  ;;  %v751_v39 = vmul.f32 %v1113_v28, %v1113_v28 }
 0x16e   : > { %v677_v35 = vadd.f32 %v676_v30, %v414_v32  ;;  %v750_v37 = vmul.f32 %v414_v32, %v414_v32  ;;  %v812_v38 = vadd.f32 %v811_v27, %v749_v25 }
 0x170   : > { %v813_v40 = vadd.f32 %v812_v38, %v750_v37  ;;  %v1116_v41 = vpop.f32.mrb[16].mxu0  ;;  %v678_v42 = vadd.f32 %v1113_v28, %v677_v35  ;;  %v1717_v44 = vpop.f32.mrb[16].mxu1 }
 0x171   : > { %v424_v46 = vpop.f32.mrb[17].mxu0  ;;  %v1719_v47 = vpop.f32.mrb[17].mxu1  ;;  %v753_v51 = vmul.f32 %v1116_v41, %v1116_v41 }
 0x172   : > { %v679_v48 = vadd.f32 %v678_v42, %v424_v46  ;;  %v752_v49 = vmul.f32 %v424_v46, %v424_v46  ;;  %v814_v50 = vadd.f32 %v813_v40, %v751_v39 }
 0x174   : > { %v815_v52 = vadd.f32 %v814_v50, %v752_v49  ;;  %v1119_v54 = vpop.f32.mrb[18].mxu0  ;;  %v680_v56 = vadd.f32 %v1116_v41, %v679_v48  ;;  %v1721_v57 = vpop.f32.mrb[18].mxu1 }
 0x175   : > { %v434_v58 = vpop.f32.mrb[19].mxu0  ;;  %v1723_v59 = vpop.f32.mrb[19].mxu1  ;;  %v755_v0 = vmul.f32 %v1119_v54, %v1119_v54 }
 0x176   : > { %v681_v60 = vadd.f32 %v680_v56, %v434_v58  ;;  %v754_v61 = vmul.f32 %v434_v58, %v434_v58  ;;  %v816_v62 = vadd.f32 %v815_v52, %v753_v51 }
 0x178   : > { %v817_v2 = vadd.f32 %v816_v62, %v754_v61  ;;  %v1122_v3 = vpop.f32.mrb[20].mxu0  ;;  %v682_v4 = vadd.f32 %v1119_v54, %v681_v60  ;;  %v1725_v5 = vpop.f32.mrb[20].mxu1 }
 0x179   : > { %v444_v6 = vpop.f32.mrb[21].mxu0  ;;  %v1727_v7 = vpop.f32.mrb[21].mxu1  ;;  %v757_v13 = vmul.f32 %v1122_v3, %v1122_v3 }
 0x17a   : > { %v683_v8 = vadd.f32 %v682_v4, %v444_v6  ;;  %v756_v10 = vmul.f32 %v444_v6, %v444_v6  ;;  %v818_v12 = vadd.f32 %v817_v2, %v755_v0 }
 0x17c   : > { %v819_v14 = vadd.f32 %v818_v12, %v756_v10  ;;  %v1125_v15 = vpop.f32.mrb[22].mxu0  ;;  %v684_v16 = vadd.f32 %v1122_v3, %v683_v8  ;;  %v1729_v17 = vpop.f32.mrb[22].mxu1 }
 0x17d   : > { %v454_v18 = vpop.f32.mrb[23].mxu0  ;;  %v1731_v20 = vpop.f32.mrb[23].mxu1  ;;  %v759_v25 = vmul.f32 %v1125_v15, %v1125_v15 }
 0x17e   : > { %v685_v22 = vadd.f32 %v684_v16, %v454_v18  ;;  %v758_v23 = vmul.f32 %v454_v18, %v454_v18  ;;  %v820_v24 = vadd.f32 %v819_v14, %v757_v13 }
 0x180   : > { %v821_v27 = vadd.f32 %v820_v24, %v758_v23  ;;  %v1128_v28 = vpop.f32.mrb[24].mxu0  ;;  %v686_v30 = vadd.f32 %v1125_v15, %v685_v22  ;;  %v1733_v32 = vpop.f32.mrb[24].mxu1 }
 0x181   : > { %v464_v35 = vpop.f32.mrb[25].mxu0  ;;  %v1735_v37 = vpop.f32.mrb[25].mxu1  ;;  %v761_v41 = vmul.f32 %v1128_v28, %v1128_v28 }
 0x182   : > { %v687_v38 = vadd.f32 %v686_v30, %v464_v35  ;;  %v760_v39 = vmul.f32 %v464_v35, %v464_v35  ;;  %v822_v40 = vadd.f32 %v821_v27, %v759_v25  ;;  %v768_v30 = vmul.f32 %v1687_v29, %v1687_v29 }
 0x184   : > { %v823_v42 = vadd.f32 %v822_v40, %v760_v39  ;;  %v1131_v46 = vpop.f32.mrb[26].mxu0  ;;  %v688_v48 = vadd.f32 %v1128_v28, %v687_v38  ;;  %v1737_v49 = vpop.f32.mrb[26].mxu1  ;;  %v769_v39 = vmul.f32 %v1685_v26, %v1685_v26 }
 0x185   : > { %v474_v50 = vpop.f32.mrb[27].mxu0  ;;  %v1739_v51 = vpop.f32.mrb[27].mxu1  ;;  %v763_v58 = vmul.f32 %v1131_v46, %v1131_v46 }
 0x186   : > { %v689_v52 = vadd.f32 %v688_v48, %v474_v50  ;;  %v762_v54 = vmul.f32 %v474_v50, %v474_v50  ;;  %v824_v56 = vadd.f32 %v823_v42, %v761_v41  ;;  %v770_v42 = vmul.f32 %v1691_v36, %v1691_v36 }
 0x187   : > { %v771_v50 = vmul.f32 %v1689_v34, %v1689_v34 }
 0x188   : > { %v825_v60 = vadd.f32 %v824_v56, %v762_v54  ;;  %v1134_v61 = vpop.f32.mrb[28].mxu0  ;;  %v690_v62 = vadd.f32 %v1131_v46, %v689_v52  ;;  %v1741_v0 = vpop.f32.mrb[28].mxu1 }
 0x189   : > { %v484_v2 = vpop.f32.mrb[29].mxu0  ;;  %v1743_v3 = vpop.f32.mrb[29].mxu1  ;;  %v765_v10 = vmul.f32 %v1134_v61, %v1134_v61 }
 0x18a   : > { %v691_v4 = vadd.f32 %v690_v62, %v484_v2  ;;  %v764_v6 = vmul.f32 %v484_v2, %v484_v2  ;;  %v826_v8 = vadd.f32 %v825_v60, %v763_v58 }
 0x18c   : > { %v827_v12 = vadd.f32 %v826_v8, %v764_v6  ;;  %v1137_v13 = vpop.f32.mrb[30].mxu0  ;;  %v692_v14 = vadd.f32 %v1134_v61, %v691_v4  ;;  %v1745_v15 = vpop.f32.mrb[30].mxu1 }
 0x18d   : > { %v494_v16 = vpop.f32.mrb[31].mxu0  ;;  %v1747_v18 = vpop.f32.mrb[31].mxu1  ;;  %v767_v25 = vmul.f32 %v1137_v13, %v1137_v13 }
 0x18e   : > { %v693_v22 = vadd.f32 %v692_v14, %v494_v16  ;;  %v766_v23 = vmul.f32 %v494_v16, %v494_v16  ;;  %v828_v24 = vadd.f32 %v827_v12, %v765_v10 }
 0x190   : > { %v694_v27 = vadd.f32 %v1137_v13, %v693_v22  ;;  %v829_v28 = vadd.f32 %v828_v24, %v766_v23 }
 0x192   : > { %v830_v35 = vadd.f32 %v829_v28, %v767_v25  ;;  %v695_v38 = vadd.f32 %v694_v27, %v1687_v29  ;;  %v772_v29 = vmul.f32 %v1695_v45, %v1695_v45 }
 0x194   : > { %v831_v40 = vadd.f32 %v830_v35, %v768_v30  ;;  %v696_v41 = vadd.f32 %v1685_v26, %v695_v38  ;;  %v773_v26 = vmul.f32 %v1693_v43, %v1693_v43 }
 0x196   : > { %v697_v46 = vadd.f32 %v696_v41, %v1691_v36  ;;  %v832_v48 = vadd.f32 %v831_v40, %v769_v39  ;;  %v774_v36 = vmul.f32 %v1699_v55, %v1699_v55 }
 0x198   : > { %v833_v52 = vadd.f32 %v832_v48, %v770_v42  ;;  %v698_v54 = vadd.f32 %v1689_v34, %v697_v46  ;;  %v775_v34 = vmul.f32 %v1697_v53, %v1697_v53 }
 0x19a   : > { %v699_v56 = vadd.f32 %v698_v54, %v1695_v45  ;;  %v834_v58 = vadd.f32 %v833_v52, %v771_v50  ;;  %v776_v45 = vmul.f32 %v1703_v1, %v1703_v1 }
 0x19c   : > { %v835_v60 = vadd.f32 %v834_v58, %v772_v29  ;;  %v700_v61 = vadd.f32 %v1693_v43, %v699_v56  ;;  %v777_v43 = vmul.f32 %v1701_v63, %v1701_v63 }
 0x19e   : > { %v701_v62 = vadd.f32 %v700_v61, %v1699_v55  ;;  %v836_v2 = vadd.f32 %v835_v60, %v773_v26  ;;  %v778_v55 = vmul.f32 %v1707_v11, %v1707_v11 }
 0x1a0   : > { %v837_v4 = vadd.f32 %v836_v2, %v774_v36  ;;  %v702_v6 = vadd.f32 %v1697_v53, %v701_v62  ;;  %v779_v53 = vmul.f32 %v1705_v9, %v1705_v9 }
 0x1a2   : > { %v703_v8 = vadd.f32 %v702_v6, %v1703_v1  ;;  %v838_v10 = vadd.f32 %v837_v4, %v775_v34  ;;  %v780_v1 = vmul.f32 %v1711_v21, %v1711_v21 }
 0x1a4   : > { %v839_v12 = vadd.f32 %v838_v10, %v776_v45  ;;  %v704_v13 = vadd.f32 %v1701_v63, %v703_v8  ;;  %v781_v63 = vmul.f32 %v1709_v19, %v1709_v19 }
 0x1a6   : > { %v705_v14 = vadd.f32 %v704_v13, %v1707_v11  ;;  %v840_v16 = vadd.f32 %v839_v12, %v777_v43  ;;  %v782_v11 = vmul.f32 %v1715_v33, %v1715_v33 }
 0x1a8   : > { %v841_v22 = vadd.f32 %v840_v16, %v778_v55  ;;  %v706_v23 = vadd.f32 %v1705_v9, %v705_v14  ;;  %v783_v9 = vmul.f32 %v1713_v31, %v1713_v31 }
 0x1aa   : > { %v707_v24 = vadd.f32 %v706_v23, %v1711_v21  ;;  %v842_v25 = vadd.f32 %v841_v22, %v779_v53  ;;  %v784_v21 = vmul.f32 %v1719_v47, %v1719_v47 }
 0x1ac   : > { %v843_v27 = vadd.f32 %v842_v25, %v780_v1  ;;  %v708_v28 = vadd.f32 %v1709_v19, %v707_v24  ;;  %v785_v19 = vmul.f32 %v1717_v44, %v1717_v44 }
 0x1ae   : > { %v709_v30 = vadd.f32 %v708_v28, %v1715_v33  ;;  %v844_v35 = vadd.f32 %v843_v27, %v781_v63  ;;  %v786_v33 = vmul.f32 %v1723_v59, %v1723_v59 }
 0x1b0   : > { %v845_v38 = vadd.f32 %v844_v35, %v782_v11  ;;  %v710_v39 = vadd.f32 %v1713_v31, %v709_v30  ;;  %v787_v31 = vmul.f32 %v1721_v57, %v1721_v57  ;;  %v663_v35 = vld [vmem:[#allocation7] sm:$0x1] }
 0x1b2   : > { %v711_v40 = vadd.f32 %v710_v39, %v1719_v47  ;;  %v846_v41 = vadd.f32 %v845_v38, %v783_v9  ;;  %v788_v47 = vmul.f32 %v1727_v7, %v1727_v7 }
 0x1b4   : > { %v847_v42 = vadd.f32 %v846_v41, %v784_v21  ;;  %v712_v46 = vadd.f32 %v1717_v44, %v711_v40  ;;  %v789_v44 = vmul.f32 %v1725_v5, %v1725_v5 }
 0x1b6   : > { %v713_v48 = vadd.f32 %v712_v46, %v1723_v59  ;;  %v848_v50 = vadd.f32 %v847_v42, %v785_v19  ;;  %v790_v59 = vmul.f32 %v1731_v20, %v1731_v20 }
 0x1b8   : > { %v849_v52 = vadd.f32 %v848_v50, %v786_v33  ;;  %v714_v54 = vadd.f32 %v1721_v57, %v713_v48  ;;  %v791_v57 = vmul.f32 %v1729_v17, %v1729_v17 }
 0x1ba   : > { %v715_v29 = vadd.f32 %v714_v54, %v1727_v7  ;;  %v850_v56 = vadd.f32 %v849_v52, %v787_v31  ;;  %v792_v7 = vmul.f32 %v1735_v37, %v1735_v37 }
 0x1bc   : > { %v851_v58 = vadd.f32 %v850_v56, %v788_v47  ;;  %v716_v26 = vadd.f32 %v1725_v5, %v715_v29  ;;  %v793_v5 = vmul.f32 %v1733_v32, %v1733_v32 }
 0x1be   : > { %v717_v60 = vadd.f32 %v716_v26, %v1731_v20  ;;  %v852_v61 = vadd.f32 %v851_v58, %v789_v44  ;;  %v794_v20 = vmul.f32 %v1739_v51, %v1739_v51 }
 0x1c0   : > { %v853_v36 = vadd.f32 %v852_v61, %v790_v59  ;;  %v718_v62 = vadd.f32 %v1729_v17, %v717_v60  ;;  %v795_v17 = vmul.f32 %v1737_v49, %v1737_v49 }
 0x1c2   : > { %v719_v2 = vadd.f32 %v718_v62, %v1735_v37  ;;  %v854_v34 = vadd.f32 %v853_v36, %v791_v57  ;;  %v796_v37 = vmul.f32 %v1743_v3, %v1743_v3 }
 0x1c4   : > { %v855_v4 = vadd.f32 %v854_v34, %v792_v7  ;;  %v720_v6 = vadd.f32 %v1733_v32, %v719_v2  ;;  %v797_v32 = vmul.f32 %v1741_v0, %v1741_v0 }
 0x1c6   : > { %v721_v45 = vadd.f32 %v720_v6, %v1739_v51  ;;  %v856_v8 = vadd.f32 %v855_v4, %v793_v5  ;;  %v798_v51 = vmul.f32 %v1747_v18, %v1747_v18 }
 0x1c8   : > { %v857_v10 = vadd.f32 %v856_v8, %v794_v20  ;;  %v722_v43 = vadd.f32 %v1737_v49, %v721_v45  ;;  %v799_v49 = vmul.f32 %v1745_v15, %v1745_v15 }
 0x1ca   : > { %v723_v12 = vadd.f32 %v722_v43, %v1743_v3  ;;  %v858_v13 = vadd.f32 %v857_v10, %v795_v17 }
 0x1cc   : > { %v859_v55 = vadd.f32 %v858_v13, %v796_v37  ;;  %v724_v14 = vadd.f32 %v1741_v0, %v723_v12 }
 0x1ce   : > { %v725_v16 = vadd.f32 %v724_v14, %v1747_v18  ;;  %v860_v53 = vadd.f32 %v859_v55, %v797_v32 }
 0x1d0   : > { %v726_v22 = vadd.f32 %v1745_v15, %v725_v16  ;;  %v861_v23 = vadd.f32 %v860_v53, %v798_v51  ;;  %v735_v15 = vld [vmem:[#allocation8] sm:$0x1] }
 0x1d2   : > { %v727_v3 = vrot.slane %v726_v22, 4  ;;  %v862_v1 = vadd.f32 %v861_v23, %v799_v49 }
 0x1d4   : > { %v728_v24 = vadd.f32 %v727_v3, %v726_v22  ;;  %v863_v25 = vrot.slane %v862_v1, 4 }
 0x1d6   : > { %v729_v63 = vrot.slane %v728_v24, 2  ;;  %v864_v27 = vadd.f32 %v863_v25, %v862_v1 }
 0x1d8   : > { %v730_v0 = vadd.f32 %v729_v63, %v728_v24  ;;  %v865_v28 = vrot.slane %v864_v27, 2 }
 0x1da   : > { %v731_v11 = vrot.slane %v730_v0, 1  ;;  %v866_v30 = vadd.f32 %v865_v28, %v864_v27 }
 0x1dc   : > { %v732_v18 = vadd.f32 %v731_v11, %v730_v0  ;;  %v867_v9 = vrot.slane %v866_v30, 1 }
 0x1de   : > { %v733_v38 = vadd.f32 %v732_v18, %v663_v35  ;;  %v868_v39 = vadd.f32 %v867_v9, %v866_v30 }
 0x1e0   : > { %734 = vst [vmem:[#allocation7] sm:$0x1] %v733_v38  ;;  %v869_v21 = vadd.f32 %v868_v39, %v735_v15 }
 0x1e1   : > { %1372 = shalt.err (!%p1369_p0)
}
 0x1e2   : > { %s1373_s27 = scalar_lea.hbm %s1913_s2, 16 }
 0x1e3   : > { %p1374_p2 = scmp.ne.s32.totalorder %s1913_s2, %s1373_s27  ;;  %p1379_p3 = scmp.lt.u32.totalorder %s1373_s27, %s1913_s2 }
 0x1e5   : > { %p1375_p11 = pnand %p1374_p2, %p1259_p1 }
 0x1e7   : > { %p1376_p13 = pneg %p1375_p11 }
 0x1e9   : > { %p1381_p8 = pnand %p1379_p3, %p1376_p13 }
 0x1eb   : > { %1384 = shalt.err (!%p1381_p8)
}
 0x1ec   : > { %1241 = dma.vmem_to_hbm [thread:$0]  (%p1259_p1), %s879_s18, 16, %s1913_s2, [#allocation4]   ;;  %870 = vst [vmem:[#allocation8] sm:$0x1] %v869_v21 }
 0x1ed   : > { %s1385_s9 = scalar_lea.vmem %s1846_s7, 16  ;;  %s1391_s11 = scalar_lea.vmem %s1846_s7, 32 }
 0x1ee   : > { %p1386_p7 = scmp.ne.s32.totalorder %s1846_s7, %s1385_s9  ;;  %p1392_p6 = scmp.lt.s32.totalorder %s1846_s7, %s1846_s7 }
 0x1ef   : > { %p1393_p9 = scmp.lt.s32.totalorder %s1391_s11, %s1385_s9 }
 0x1f0   : > { %p1387_p4 = pnand %p1386_p7, %p1259_p1 }
 0x1f1   : > { %p1394_p10 = por %p1393_p9, %p1392_p6 }
 0x1f2   : > { %p1388_p5 = pneg %p1387_p4 }
 0x1f4   : > { %p1395_p12 = pnand %p1394_p10, %p1388_p5 }
 0x1f6   : > { %1398 = shalt.err (!%p1395_p12)
}
 0x1f7   : > { %s1399_s25 = scalar_lea.hbm %s1914_s3, 16 }
 0x1f8   : > { %p1400_p0 = scmp.ne.s32.totalorder %s1914_s3, %s1399_s25  ;;  %p1405_p13 = scmp.lt.u32.totalorder %s1399_s25, %s1914_s3 }
 0x1fa   : > { %p1401_p2 = pnand %p1400_p0, %p1259_p1 }
 0x1fc   : > { %p1402_p11 = pneg %p1401_p2 }
 0x1fe   : > { %p1407_p3 = pnand %p1405_p13, %p1402_p11 }
 0x200   : > { %1410 = shalt.err (!%p1407_p3)
}
 0x201   : > { %1243 = dma.vmem_to_hbm [thread:$0]  (%p1259_p1), %s1846_s7, 16, %s1914_s3, [#allocation9]  }
 0x202   : > { %1436 = dma.done.wait (%p1259_p1), [#allocation4], 16  }
 0x203   : > { %1438 = vsyncadd (%p1259_p1), [#allocation4], 4294967280 }
 0x204   : > { %1440 = dma.done.wait (%p1259_p1), [#allocation9], 16  }
 0x205   : > { %1442 = vsyncadd (%p1259_p1), [#allocation9], 4294967280 }
 0x206 PF: > { %p17_p8 = scmp.ge.s32.totalorder %s1531_s22, 5   ;;  %s1927_s12 = smov %s1449_s13 }
 0x207   : > { %s1928_s13 = smov %s1453_s14  ;;  %s1929_s14 = smov %s1560_s10 }
 0x208   : > { %s1930_s15 = smov %s1531_s22  ;;  %19 = sbr.rel (!%p17_p8) target bundleno = 6 (0x6), region = 81 }
 0x20f   :  { %906 = vsyncpa [#allocation3], 1 }
 0x210   :  { %908 = vsyncpa [#allocation3 + $0x1], 1 }
 0x211   :  { %909 = vsyncpa [#allocation6], 1 }
 0x212   :  { %910 = vsyncpa [#allocation4], 1 }
 0x213   :  { %912 = vsyncpa [#allocation4 + $0x1], 1 }
 0x214   :  { %913 = vsyncpa [#allocation9], 1 }

</bundles_post_ra>
